<compile_context>
chip_gen: v7x
topology: tpu7x:2x2x1
jax: 0.10.0
libtpu: 0.0.40
codegen_flags: <defaults>
</compile_context>

<pallas_src>
import jax
import jax.numpy as jnp
from jax.experimental import pallas as pl
from jax.experimental.pallas import tpu as pltpu


def _make_scale_kernel(scale: float):
    def kernel(x_ref, o_ref):
        # Single VPU elementwise multiply; scale is baked in as a constant.
        o_ref[...] = x_ref[...] * scale
    return kernel


def scale_forward(x: jax.Array, scale: float) -> jax.Array:
    """Equivalent of PyTorch Scale(scale)(x): elementwise x * scale."""
    orig_shape = x.shape
    dtype = x.dtype
    itemsize = jnp.dtype(dtype).itemsize
    total = x.size

    if total == 0:
        return x

    # Sublane packing granularity for the dtype: f32 -> 8, bf16 -> 16, 8-bit -> 32.
    sub = max(8, (4 // max(itemsize, 1)) * 8)

    flat = x.reshape(-1)

    # ---- Choose a lane-dense 2D view (rows, cols), cols multiple of 128 ----
    cols = None
    for cand in (4096, 2048, 1024, 512, 256, 128):
        if total % cand == 0:
            cols = cand
            break

    if cols is None:
        # Element count not divisible by 128: pad the flat vector up to a tile
        # boundary, run the same tiled path, slice the padding off afterwards.
        cols = 512
        unit = cols * sub
        padded_total = ((total + unit - 1) // unit) * unit
        flat = jnp.pad(flat, (0, padded_total - total))
    else:
        padded_total = total

    rows = padded_total // cols
    x2d = flat.reshape(rows, cols)

    # ---- Tile rows: ~2 MiB per tile, sublane-aligned for the dtype ----------
    target_bytes = 2 * 1024 * 1024
    if rows <= sub:
        tr = rows                                    # full-extent block (legal)
    else:
        tr = max(1, target_bytes // (cols * itemsize))
        tr = max(sub, (min(tr, rows) // sub) * sub)  # multiple of `sub`

    grid = (pl.cdiv(rows, tr),)

    cost = pl.CostEstimate(
        flops=padded_total,
        transcendentals=0,
        bytes_accessed=2 * padded_total * itemsize,
    )

    out2d = pl.pallas_call(
        _make_scale_kernel(float(scale)),
        out_shape=jax.ShapeDtypeStruct((rows, cols), dtype),
        grid=grid,
        in_specs=[pl.BlockSpec((tr, cols), lambda i: (i, 0))],
        out_specs=pl.BlockSpec((tr, cols), lambda i: (i, 0)),
        compiler_params=pltpu.CompilerParams(
            dimension_semantics=("parallel",),
        ),
        cost_estimate=cost,
    )(x2d)

    out_flat = out2d.reshape(-1)
    if padded_total != total:
        out_flat = out_flat[:total]
    return out_flat.reshape(orig_shape)


if __name__ == "__main__":
    key = jax.random.PRNGKey(0)
    scale = 0.125  # e.g. dim_head ** -0.5 style scale

    # Small NCHW input consistent with the module's usage.
    x = jax.random.normal(key, (2, 4, 16, 16), dtype=jnp.float32)
    out = jax.block_until_ready(scale_forward(x, scale))
    ref = x * scale
    assert out.shape == x.shape and out.dtype == x.dtype
    assert jnp.allclose(out, ref, atol=1e-6, rtol=1e-6)

    # Larger input to exercise the tiled, multi-step pipelined path.
    key2 = jax.random.PRNGKey(1)
    x_big = jax.random.normal(key2, (16, 16, 64, 128), dtype=jnp.float32)
    out_big = jax.block_until_ready(scale_forward(x_big, scale))
    ref_big = x_big * scale
    assert out_big.shape == x_big.shape and out_big.dtype == x_big.dtype
    assert jnp.allclose(out_big, ref_big, atol=1e-6, rtol=1e-6)

    # Odd-sized input (element count not divisible by 128) -> padded path.
    key3 = jax.random.PRNGKey(2)
    x_odd = jax.random.normal(key3, (3, 5, 7, 11), dtype=jnp.float32)
    out_odd = jax.block_until_ready(scale_forward(x_odd, scale))
    ref_odd = x_odd * scale
    assert out_odd.shape == x_odd.shape and out_odd.dtype == x_odd.dtype
    assert jnp.allclose(out_odd, ref_odd, atol=1e-6, rtol=1e-6)

    # bf16 input to exercise the sublane-packing-aware tiling.
    x_bf16 = jax.random.normal(key, (2, 8, 32, 64), dtype=jnp.bfloat16)
    out_bf16 = jax.block_until_ready(scale_forward(x_bf16, scale))
    ref_bf16 = x_bf16 * jnp.bfloat16(scale)
    assert out_bf16.shape == x_bf16.shape and out_bf16.dtype == x_bf16.dtype
    assert jnp.allclose(out_bf16.astype(jnp.float32),
                        ref_bf16.astype(jnp.float32), atol=1e-2, rtol=1e-2)

    print("KERNEL_OK")
</pallas_src>

<mosaic_0001>
module attributes {stable_mosaic.version = 11 : i64} {
  func.func @kernel(%arg0: i32, %arg1: memref<1x2048xf32, #tpu.memory_space<vmem>>, %arg2: memref<1x2048xf32, #tpu.memory_space<vmem>>) attributes {dimension_semantics = [#tpu.dimension_semantics<parallel>], iteration_bounds = array<i64: 1>, scalar_prefetch = 0 : i64, scratch_operands = 0 : i64, tpu.core_type = #tpu.core_type<tc>, window_params = [{transform_indices = @transform_0, window_bounds = array<i64: 1, 2048>}, {transform_indices = @transform_1, window_bounds = array<i64: 1, 2048>}]} {
    %c0 = arith.constant 0 : index
    %c0_0 = arith.constant 0 : index
    %0 = vector.load %arg1[%c0, %c0_0] : memref<1x2048xf32, #tpu.memory_space<vmem>>, vector<1x2048xf32>
    %cst = arith.constant 1.250000e-01 : f32
    %1 = vector.broadcast %cst : f32 to vector<1x2048xf32>
    %2 = arith.mulf %0, %1 : vector<1x2048xf32>
    %c0_1 = arith.constant 0 : index
    %c0_2 = arith.constant 0 : index
    %3 = vector.load %arg2[%c0_1, %c0_2] : memref<1x2048xf32, #tpu.memory_space<vmem>>, vector<1x2048xf32>
    tpu.vector_store %arg2[%c0_1, %c0_2], %2 {strides = array<i32>} : memref<1x2048xf32, #tpu.memory_space<vmem>>, vector<1x2048xf32>,
    return
  }
  func.func @transform_0(%arg0: i32) -> (i32, i32) {
    %c0_i32 = arith.constant 0 : i32
    %c0_i32_0 = arith.constant 0 : i32
    return %arg0, %c0_i32 : i32, i32
  }
  func.func @transform_1(%arg0: i32) -> (i32, i32) {
    %c0_i32 = arith.constant 0 : i32
    %c0_i32_0 = arith.constant 0 : i32
    return %arg0, %c0_i32 : i32, i32
  }
}

</mosaic_0001>

<bundles_post_ra>
// kernel: tpu_custom_call.1
= control target key start
LH: loop header
LB: loop body
LE: loop exit
PB: predicated region body
PF: predicated region fallthrough
CT: control target
= control target key end

     0   :  { %6 = vsyncpa [#allocation3], 0  ;;  %s128_s0 = inlined_call_operand.hbm [shape: f32[1,2048], index: 0, kind: input, shape index: {}]   ;;  %s129_s1 = inlined_call_operand.hbm [shape: f32[1,2048], index: 1, kind: output, shape index: {}]  }
   0x1   :  { %7 = vsyncpa [#allocation4], 0  ;;  %s92_s6 = smov [#allocation2]   ;;  %s44_s10 = scalar_lea.hbm %s128_s0, 256 }
   0x2   :  { %s14_s7 = sshll.u32 %s92_s6, 4  ;;  %p45_p0 = scmp.ne.s32.totalorder %s128_s0, %s44_s10  ;;  %s15_s7 = int_to_ptr.vmem [resolvable:$true] %s14_s7 }
   0x3   :  { %p48_p1 = scmp.lt.u32.totalorder %s44_s10, %s128_s0 }
   0x5   :  { %p50_p2 = pnand %p48_p1, %p45_p0 }
   0x7   :  { %53 = shalt.err (!%p50_p2)
}
   0x8   :  { %s54_s15 = scalar_lea.vmem %s15_s7, 256  ;;  %p59_p4 = scmp.lt.s32.totalorder %s15_s7, %s15_s7 }
   0x9   :  { %p55_p3 = scmp.ne.s32.totalorder %s15_s7, %s54_s15  ;;  %p60_p5 = scmp.lt.s32.totalorder %s54_s15, %s54_s15 }
   0xb   :  { %p61_p6 = por %p60_p5, %p59_p4 }
   0xd   :  { %p62_p7 = pnand %p61_p6, %p55_p3 }
   0xf   :  { %65 = shalt.err (!%p62_p7)
}
  0x10   :  { %17 = dma.hbm_to_vmem [thread:$0]  %s128_s0, 256, %s15_s7, [#allocation3]  }
  0x11   :  { %88 = dma.done.wait [#allocation3], 256  }
  0x12   :  { %89 = vsyncadd [#allocation3], 4294967040  ;;  %s93_s18 = smov [#allocation5]   ;;  %v21_v0 = vld [vmem:[#allocation2] sm:$0xff]  ;;  %v22_v1 = vld [vmem:[#allocation2 + $0x8] sm:$0xff] }
  0x13   :  { %s33_s19 = sshll.u32 %s93_s18, 4  ;;  %v23_v2 = vmul.f32 0.125, %v21_v0  ;;  %v24_v3 = vmul.f32 0.125, %v22_v1  ;;  %s34_s19 = int_to_ptr.vmem [resolvable:$true] %s33_s19 }
  0x14   :  { %s66_s20 = scalar_lea.vmem %s34_s19, 256  ;;  %p71_p9 = scmp.lt.s32.totalorder %s34_s19, %s34_s19 }
  0x15   :  { %25 = vst [vmem:[#allocation5] sm:$0xff] %v23_v2  ;;  %26 = vst [vmem:[#allocation5 + $0x8] sm:$0xff] %v24_v3  ;;  %p67_p8 = scmp.ne.s32.totalorder %s34_s19, %s66_s20  ;;  %p72_p10 = scmp.lt.s32.totalorder %s66_s20, %s66_s20 }
  0x17   :  { %p73_p11 = por %p72_p10, %p71_p9 }
  0x19   :  { %p74_p12 = pnand %p73_p11, %p67_p8 }
  0x1b   :  { %77 = shalt.err (!%p74_p12)
}
  0x1c   :  { %s78_s22 = scalar_lea.hbm %s129_s1, 256 }
  0x1d   :  { %p79_p13 = scmp.ne.s32.totalorder %s129_s1, %s78_s22  ;;  %p82_p0 = scmp.lt.u32.totalorder %s78_s22, %s129_s1 }
  0x1f   :  { %p84_p1 = pnand %p82_p0, %p79_p13 }
  0x21   :  { %87 = shalt.err (!%p84_p1)
}
  0x22   :  { %36 = dma.vmem_to_hbm [thread:$0]  %s34_s19, 256, %s129_s1, [#allocation4]  }
  0x23   :  { %90 = dma.done.wait [#allocation4], 256  }
  0x24   :  { %91 = vsyncadd [#allocation4], 4294967040 }
  0x25   :  { %40 = vsyncpa [#allocation3], 1 }
  0x26   :  { %41 = vsyncpa [#allocation4], 1 }

</bundles_post_ra>
